<compile_context>
chip_gen: v5e
topology: v5e:2x2
jax: 0.10.0
libtpu: 0.0.40
codegen_flags: <defaults>
</compile_context>

<pallas_src>
import math
from functools import partial

import jax
import jax.numpy as jnp
from jax import lax
from jax.experimental import pallas as pl
from jax.experimental.pallas import tpu as pltpu


# ---------------------------------------------------------------------------
# Hardware-aware helpers
# ---------------------------------------------------------------------------
def _vmem_capacity_bytes():
    try:
        info = pltpu.get_tpu_info()
        cap = getattr(info, "vmem_capacity_bytes", None)
        if cap:
            return int(cap)
    except Exception:
        pass
    return 64 * 1024 * 1024          # conservative floor (v7x per-TC VMEM)


def _vmem_limit(need_bytes, vmem_cap):
    lim = int(min(max(2 * need_bytes, 32 << 20), int(0.9 * vmem_cap)))
    return max(lim, min(int(need_bytes) + (4 << 20), int(vmem_cap)))


def _pick_row_tile(M, pref=256):
    """Largest sublane-aligned divisor of M <= pref (never pads M)."""
    if M <= pref:
        return M
    for t in range(pref, 7, -8):                 # multiples of 8
        if M % t == 0:
            return t
    return M                                      # ragged fallback: full rows


def _pick_col_tile(N, pref=1024):
    """Largest lane-aligned divisor of N <= pref (keeps stores lane-dense)."""
    if N <= pref:
        return N
    for t in range(pref, 127, -128):             # multiples of 128
        if N % t == 0:
            return t
    return N


def _attn_vmem_bytes(TQ, S, Dk, isz, has_mask, with_attn):
    """Double-buffered streams + live f32 [TQ,S] intermediates."""
    need = 2 * (TQ * Dk * isz          # q tile in
                + 2 * S * Dk * isz     # k + v in
                + TQ * Dk * isz)       # ctx tile out
    if has_mask:
        need += 2 * TQ * S             # int8 mask tile
    if with_attn:
        need += 2 * TQ * S * isz       # attention-weights tile out
    need += 4 * TQ * S * 4             # f32 scores / e / attn / p
    return need


def _query_tile_candidates(S):
    cands = [S] if S <= 512 else []
    start = min(S - 1, 512) // 8 * 8
    cands += [t for t in range(start, 7, -8) if S % t == 0]
    return cands or [S]


# ---------------------------------------------------------------------------
# Q/K/V projection: y = x @ W^T + b, written head-major [H(or 3H), M, Dk]
# ---------------------------------------------------------------------------
def _proj_heads_kernel(x_ref, w_ref, b_ref, o_ref):
    y = jnp.dot(x_ref[...], w_ref[...], preferred_element_type=jnp.float32)
    o_ref[...] = (y + b_ref[...].astype(jnp.float32)).astype(o_ref.dtype)


def _project_heads(x, w_heads, b_heads, *, vmem_cap):
    """x: [M, d_in]; w_heads: [Ht, d_in, Dk]; b_heads: [Ht, 1, Dk] -> [Ht, M, Dk]."""
    M, d_in = x.shape
    Ht, _, Dk = w_heads.shape
    TM = _pick_row_tile(M)
    isz = x.dtype.itemsize
    need = 2 * (TM * d_in + d_in * Dk + Dk + TM * Dk) * isz + TM * Dk * 4

    return pl.pallas_call(
        _proj_heads_kernel,
        out_shape=jax.ShapeDtypeStruct((Ht, M, Dk), x.dtype),
        grid=(M // TM, Ht),
        in_specs=[
            pl.BlockSpec((TM, d_in), lambda i, h: (i, 0)),
            pl.BlockSpec((None, d_in, Dk), lambda i, h: (h, 0, 0)),
            pl.BlockSpec((None, 1, Dk), lambda i, h: (h, 0, 0)),
        ],
        out_specs=pl.BlockSpec((None, TM, Dk), lambda i, h: (h, i, 0)),
        compiler_params=pltpu.CompilerParams(
            dimension_semantics=("parallel", "parallel"),
            vmem_limit_bytes=_vmem_limit(need, vmem_cap)),
    )(x, w_heads, b_heads)


# ---------------------------------------------------------------------------
# Output projection: out = concat_heads(ctx) @ Wo^T + bo
# (head merge folded into a per-head reduction; no transpose of ctx)
# ---------------------------------------------------------------------------
def _out_proj_kernel(x_ref, w_ref, b_ref, o_ref, acc_ref):
    h = pl.program_id(2)

    @pl.when(h == 0)
    def _():
        acc_ref[...] = jnp.zeros_like(acc_ref)

    acc_ref[...] += jnp.dot(x_ref[...], w_ref[...],
                            preferred_element_type=jnp.float32)

    @pl.when(h == pl.num_programs(2) - 1)
    def _():
        o_ref[...] = (acc_ref[...] + b_ref[...].astype(jnp.float32)
                      ).astype(o_ref.dtype)


def _out_projection(ctx, w, b, *, vmem_cap):
    """ctx: [H, M, Dk] head-major; w: [d_out, H*Dk]; b: [d_out] -> [M, d_out]."""
    H, M, Dk = ctx.shape
    d_out = w.shape[0]
    # [h, dk, n] = w[n, h*Dk + dk]   (only the small weight is re-laid-out)
    wt = jnp.transpose(w).reshape(H, Dk, d_out)
    b2 = b.reshape(1, d_out)

    TM = _pick_row_tile(M)
    TN = _pick_col_tile(d_out)
    isz = ctx.dtype.itemsize
    need = 2 * (TM * Dk + Dk * TN + TN + TM * TN) * isz + TM * TN * 4

    return pl.pallas_call(
        _out_proj_kernel,
        out_shape=jax.ShapeDtypeStruct((M, d_out), ctx.dtype),
        grid=(M // TM, d_out // TN, H),
        in_specs=[
            pl.BlockSpec((None, TM, Dk), lambda i, j, h: (h, i, 0)),
            pl.BlockSpec((None, Dk, TN), lambda i, j, h: (h, 0, j)),
            pl.BlockSpec((1, TN), lambda i, j, h: (0, j)),
        ],
        out_specs=pl.BlockSpec((TM, TN), lambda i, j, h: (i, j)),
        scratch_shapes=[pltpu.VMEM((TM, TN), jnp.float32)],
        compiler_params=pltpu.CompilerParams(
            dimension_semantics=("parallel", "parallel", "arbitrary"),
            vmem_limit_bytes=_vmem_limit(need, vmem_cap)),
    )(ctx, wt, b2)


# ---------------------------------------------------------------------------
# Scaled dot-product attention (one (batch, head, query-tile) per grid step)
# ---------------------------------------------------------------------------
def _attn_kernel(*refs, scale, has_mask, with_attn):
    q_ref, k_ref, v_ref = refs[0], refs[1], refs[2]
    i = 3
    m_ref = None
    if has_mask:
        m_ref = refs[i]
        i += 1
    o_ref = refs[i]
    i += 1
    a_ref = refs[i] if with_attn else None

    # Fold 1/sqrt(d_k) into q ([TQ,Dk] mults, not [TQ,S]); operands stay in the
    # input dtype so bf16 inputs hit the bf16-native MXU path.
    q = q_ref[...] * scale                                   # [TQ, Dk]
    k = k_ref[...]                                           # [S , Dk]
    v = v_ref[...]                                           # [S , Dk]

    # scores = q @ k^T, contracting the lane dim of both operands
    # (no explicit transpose / XLU pass); f32 accumulation on the MXU.
    scores = lax.dot_general(q, k, (((1,), (1,)), ((), ())),
                             preferred_element_type=jnp.float32)  # [TQ, S]

    if has_mask:
        scores = jnp.where(m_ref[...] == 0, jnp.float32(-1.0e9), scores)

    # Numerically-stable exact softmax in f32 (rows sum to 1, matches torch).
    m_row = jnp.max(scores, axis=-1, keepdims=True)
    e = jnp.exp(scores - m_row)
    denom = jnp.sum(e, axis=-1, keepdims=True)
    attn = e / denom                                          # [TQ, S] f32

    p = attn.astype(v.dtype)                                  # single cast, reused
    out = jnp.dot(p, v, preferred_element_type=jnp.float32)   # [TQ, Dk]

    o_ref[...] = out.astype(o_ref.dtype)
    if with_attn:
        a_ref[...] = p if a_ref.dtype == p.dtype else attn.astype(a_ref.dtype)


def _head_q_map(off):
    return lambda b, h, qi: (off + h, b, qi, 0)


def _head_kv_map(off):
    return lambda b, h, qi: (off + h, b, 0, 0)


def _self_attention_heads(qa, ka, va, offs, H, B, S, Dk, mask, *,
                          return_attention, vmem_cap):
    """qa/ka/va: head-major [Ht, B, S, Dk] (may be the same fused array).
    Returns (ctx [H, B, S, Dk], attn [B, H, S, S] or None)."""
    dt = qa.dtype
    isz = dt.itemsize
    scale = 1.0 / math.sqrt(Dk)
    has_mask = mask is not None

    # Normalize the mask WITHOUT broadcasting over heads unless necessary.
    mask4 = False
    m = None
    if has_mask:
        m = jnp.asarray(mask)
        if m.ndim == 4 and m.shape[1] != 1:
            m = jnp.broadcast_to(m, (B, H, S, S)).astype(jnp.int8)
            mask4 = True
        else:
            if m.ndim == 4:
                m = jnp.squeeze(m, axis=1)
            m = jnp.broadcast_to(m, (B, S, S)).astype(jnp.int8)

    # Generation-aware query tile: biggest divisor of S whose true
    # double-buffered footprint fits ~60% of this chip's VMEM.
    budget = int(vmem_cap * 0.6)
    cands = _query_tile_candidates(S)
    TQ = cands[-1]
    for t in cands:
        if _attn_vmem_bytes(t, S, Dk, isz, has_mask, return_attention) <= budget:
            TQ = t
            break
    need = _attn_vmem_bytes(TQ, S, Dk, isz, has_mask, return_attention)

    q_off, k_off, v_off = offs
    inputs = [qa, ka, va]
    in_specs = [
        pl.BlockSpec((None, None, TQ, Dk), _head_q_map(q_off)),
        pl.BlockSpec((None, None, S, Dk), _head_kv_map(k_off)),
        pl.BlockSpec((None, None, S, Dk), _head_kv_map(v_off)),
    ]
    if has_mask:
        if mask4:
            in_specs.append(pl.BlockSpec((None, None, TQ, S),
                                         lambda b, h, qi: (b, h, qi, 0)))
        else:
            in_specs.append(pl.BlockSpec((None, TQ, S),
                                         lambda b, h, qi: (b, qi, 0)))
        inputs.append(m)

    out_shapes = [jax.ShapeDtypeStruct((H, B, S, Dk), dt)]       # head-major ctx
    out_specs = [pl.BlockSpec((None, None, TQ, Dk),
                              lambda b, h, qi: (h, b, qi, 0))]
    if return_attention:
        out_shapes.append(jax.ShapeDtypeStruct((B, H, S, S), dt))  # torch layout
        out_specs.append(pl.BlockSpec((None, None, TQ, S),
                                      lambda b, h, qi: (b, h, qi, 0)))

    results = pl.pallas_call(
        partial(_attn_kernel, scale=scale, has_mask=has_mask,
                with_attn=return_attention),
        out_shape=tuple(out_shapes),
        grid=(B, H, S // TQ),
        in_specs=in_specs,
        out_specs=tuple(out_specs),
        compiler_params=pltpu.CompilerParams(
            dimension_semantics=("parallel", "parallel", "parallel"),
            vmem_limit_bytes=_vmem_limit(need, vmem_cap)),
    )(*inputs)

    ctx = results[0]
    attn = results[1] if return_attention else None
    return ctx, attn


# ---------------------------------------------------------------------------
# MultiHeadAttention forward
# ---------------------------------------------------------------------------
def multi_head_attention(Q, K, V, params, num_heads, mask=None, *,
                         return_attention=True):
    B, S, d_model = Q.shape
    H = num_heads
    Dk = d_model // H
    M = B * S
    vmem_cap = _vmem_capacity_bytes()

    def head_weights(w):      # [d_out, d_in] -> [H, d_in, Dk]
        return w.reshape(H, Dk, d_model).transpose(0, 2, 1)

    def head_bias(b):         # [d_out] -> [H, 1, Dk]
        return b.reshape(H, 1, Dk)

    fused = (K is Q) and (V is Q)
    if fused:
        # One projection pass over the shared activation (read once, not 3x).
        w_all = jnp.concatenate([head_weights(params["q_w"]),
                                 head_weights(params["k_w"]),
                                 head_weights(params["v_w"])], axis=0)
        b_all = jnp.concatenate([head_bias(params["q_b"]),
                                 head_bias(params["k_b"]),
                                 head_bias(params["v_b"])], axis=0)
        qkv = _project_heads(Q.reshape(M, d_model), w_all, b_all,
                             vmem_cap=vmem_cap).reshape(3 * H, B, S, Dk)
        qa = ka = va = qkv
        offs = (0, H, 2 * H)
    else:
        qa = _project_heads(Q.reshape(M, d_model), head_weights(params["q_w"]),
                            head_bias(params["q_b"]),
                            vmem_cap=vmem_cap).reshape(H, B, S, Dk)
        ka = _project_heads(K.reshape(M, d_model), head_weights(params["k_w"]),
                            head_bias(params["k_b"]),
                            vmem_cap=vmem_cap).reshape(H, B, S, Dk)
        va = _project_heads(V.reshape(M, d_model), head_weights(params["v_w"]),
                            head_bias(params["v_b"]),
                            vmem_cap=vmem_cap).reshape(H, B, S, Dk)
        offs = (0, 0, 0)

    ctx, attn = _self_attention_heads(qa, ka, va, offs, H, B, S, Dk, mask,
                                      return_attention=return_attention,
                                      vmem_cap=vmem_cap)

    # Head merge is folded into the output projection (per-head reduction).
    out = _out_projection(ctx.reshape(H, M, Dk), params["o_w"], params["o_b"],
                          vmem_cap=vmem_cap).reshape(B, S, d_model)
    return out, (attn if return_attention else None)


# ---------------------------------------------------------------------------
# Pure-JAX reference (mirrors the PyTorch module exactly)
# ---------------------------------------------------------------------------
def _reference_mha(Q, K, V, params, num_heads, mask=None):
    B, S, d_model = Q.shape
    d_k = d_model // num_heads

    def lin(x, w, b):
        return x @ w.T + b

    def split(x):
        return x.reshape(B, S, num_heads, d_k).transpose(0, 2, 1, 3)

    q = split(lin(Q, params["q_w"], params["q_b"]))
    k = split(lin(K, params["k_w"], params["k_b"]))
    v = split(lin(V, params["v_w"], params["v_b"]))

    scores = jnp.einsum("bhqd,bhkd->bhqk", q, k) / math.sqrt(d_k)
    if mask is not None:
        scores = jnp.where(mask == 0, -1.0e9, scores)
    attn = jax.nn.softmax(scores, axis=-1)
    ctx = jnp.einsum("bhqk,bhkd->bhqd", attn, v)
    concat = ctx.transpose(0, 2, 1, 3).reshape(B, S, d_model)
    out = lin(concat, params["o_w"], params["o_b"])
    return out, attn


if __name__ == "__main__":
    B, S, d_model, H = 2, 8, 32, 4
    key = jax.random.PRNGKey(0)
    ks = jax.random.split(key, 12)

    Q = jax.random.normal(ks[0], (B, S, d_model), dtype=jnp.float32)
    K = jax.random.normal(ks[1], (B, S, d_model), dtype=jnp.float32)
    V = jax.random.normal(ks[2], (B, S, d_model), dtype=jnp.float32)

    def lin_init(kw, kb, fan_in, fan_out):
        lim = 1.0 / math.sqrt(fan_in)
        w = jax.random.uniform(kw, (fan_out, fan_in), jnp.float32, -lim, lim)
        b = jax.random.uniform(kb, (fan_out,), jnp.float32, -lim, lim)
        return w, b

    params = {}
    for name, (kw, kb) in zip(
            ("q", "k", "v", "o"),
            ((ks[3], ks[4]), (ks[5], ks[6]), (ks[7], ks[8]), (ks[9], ks[10]))):
        w, b = lin_init(kw, kb, d_model, d_model)
        params[f"{name}_w"] = w
        params[f"{name}_b"] = b

    # Broadcastable 0/1 mask of shape [B, 1, S, S] (1 = keep, 0 = -1e9 fill).
    mask = (jax.random.uniform(ks[11], (B, 1, S, S)) > 0.2).astype(jnp.int32)

    # 1) Masked path (distinct Q/K/V).
    out, attn = multi_head_attention(Q, K, V, params, H, mask)
    jax.block_until_ready((out, attn))
    out_ref, attn_ref = _reference_mha(Q, K, V, params, H, mask)
    assert out.shape == (B, S, d_model) and attn.shape == (B, H, S, S)
    assert jnp.allclose(out, out_ref, atol=1e-2, rtol=1e-2), "masked output mismatch"
    assert jnp.allclose(attn, attn_ref, atol=1e-2, rtol=1e-2), "masked attention mismatch"

    # 2) mask=None path (specialized no-mask kernel, zero mask traffic).
    out2, attn2 = multi_head_attention(Q, K, V, params, H)
    jax.block_until_ready((out2, attn2))
    out2_ref, attn2_ref = _reference_mha(Q, K, V, params, H)
    assert jnp.allclose(out2, out2_ref, atol=1e-2, rtol=1e-2), "no-mask output mismatch"
    assert jnp.allclose(attn2, attn2_ref, atol=1e-2, rtol=1e-2), "no-mask attention mismatch"

    # 3) return_attention=False path: skips the [B,H,S,S] HBM writeback entirely.
    out3, attn3 = multi_head_attention(Q, K, V, params, H, mask,
                                       return_attention=False)
    jax.block_until_ready(out3)
    assert attn3 is None
    assert jnp.allclose(out3, out_ref, atol=1e-2, rtol=1e-2), "no-attn-output mismatch"

    # 4) Fused-QKV self-attention path (Q is K is V): one projection call.
    out4, attn4 = multi_head_attention(Q, Q, Q, params, H, mask)
    jax.block_until_ready((out4, attn4))
    out4_ref, attn4_ref = _reference_mha(Q, Q, Q, params, H, mask)
    assert jnp.allclose(out4, out4_ref, atol=1e-2, rtol=1e-2), "fused output mismatch"
    assert jnp.allclose(attn4, attn4_ref, atol=1e-2, rtol=1e-2), "fused attention mismatch"

    print("KERNEL_OK")
</pallas_src>

<mosaic_0001>
module attributes {stable_mosaic.version = 11 : i64} {
  func.func @_proj_heads_kernel(%arg0: i32, %arg1: i32, %arg2: memref<16x32xf32, #tpu.memory_space<vmem>>, %arg3: memref<1x32x8xf32, #tpu.memory_space<vmem>>, %arg4: memref<1x1x8xf32, #tpu.memory_space<vmem>>, %arg5: memref<1x16x8xf32, #tpu.memory_space<vmem>>) attributes {dimension_semantics = [#tpu.dimension_semantics<parallel>, #tpu.dimension_semantics<parallel>], iteration_bounds = array<i64: 1, 4>, scalar_prefetch = 0 : i64, scratch_operands = 0 : i64, tpu.core_type = #tpu.core_type<tc>, window_params = [{transform_indices = @transform_0, window_bounds = array<i64: 16, 32>}, {transform_indices = @transform_1, window_bounds = array<i64: 1, 32, 8>}, {transform_indices = @transform_2, window_bounds = array<i64: 1, 1, 8>}, {transform_indices = @transform_3, window_bounds = array<i64: 1, 16, 8>}]} {
    %c0 = arith.constant 0 : index
    %c0_0 = arith.constant 0 : index
    %0 = vector.load %arg2[%c0, %c0_0] : memref<16x32xf32, #tpu.memory_space<vmem>>, vector<16x32xf32>
    %c0_1 = arith.constant 0 : index
    %c0_2 = arith.constant 0 : index
    %c0_3 = arith.constant 0 : index
    %1 = vector.load %arg3[%c0_1, %c0_2, %c0_3] : memref<1x32x8xf32, #tpu.memory_space<vmem>>, vector<1x32x8xf32>
    %2 = vector.shape_cast %1 : vector<1x32x8xf32> to vector<32x8xf32>
    %cst = arith.constant dense<0.000000e+00> : vector<16x8xf32>
    %3 = tpu.matmul %0, %2, %cst {dimension_numbers = #tpu.dot_dimension_numbers<[1], [0], [0], [1], [0, 0, 1, 1], [], []>} : vector<16x32xf32>, vector<32x8xf32>, vector<16x8xf32> -> vector<16x8xf32>
    %c0_4 = arith.constant 0 : index
    %c0_5 = arith.constant 0 : index
    %c0_6 = arith.constant 0 : index
    %4 = vector.load %arg4[%c0_4, %c0_5, %c0_6] : memref<1x1x8xf32, #tpu.memory_space<vmem>>, vector<1x1x8xf32>
    %5 = vector.shape_cast %4 : vector<1x1x8xf32> to vector<1x8xf32>
    %6 = vector.broadcast %5 : vector<1x8xf32> to vector<16x8xf32>
    %7 = arith.addf %3, %6 : vector<16x8xf32>
    %c0_7 = arith.constant 0 : index
    %c0_8 = arith.constant 0 : index
    %c0_9 = arith.constant 0 : index
    %8 = vector.load %arg5[%c0_7, %c0_8, %c0_9] : memref<1x16x8xf32, #tpu.memory_space<vmem>>, vector<1x16x8xf32>
    %9 = vector.shape_cast %8 : vector<1x16x8xf32> to vector<16x8xf32>
    %10 = vector.shape_cast %7 : vector<16x8xf32> to vector<1x16x8xf32>
    tpu.vector_store %arg5[%c0_7, %c0_8, %c0_9], %10 {strides = array<i32>} : memref<1x16x8xf32, #tpu.memory_space<vmem>>, vector<1x16x8xf32>,
    return
  }
  func.func @transform_0(%arg0: i32, %arg1: i32) -> (i32, i32) {
    %c0_i32 = arith.constant 0 : i32
    %c0_i32_0 = arith.constant 0 : i32
    return %arg0, %c0_i32 : i32, i32
  }
  func.func @transform_1(%arg0: i32, %arg1: i32) -> (i32, i32, i32) {
    %c0_i32 = arith.constant 0 : i32
    %c0_i32_0 = arith.constant 0 : i32
    %c0_i32_1 = arith.constant 0 : i32
    return %arg1, %c0_i32, %c0_i32_0 : i32, i32, i32
  }
  func.func @transform_2(%arg0: i32, %arg1: i32) -> (i32, i32, i32) {
    %c0_i32 = arith.constant 0 : i32
    %c0_i32_0 = arith.constant 0 : i32
    %c0_i32_1 = arith.constant 0 : i32
    return %arg1, %c0_i32, %c0_i32_0 : i32, i32, i32
  }
  func.func @transform_3(%arg0: i32, %arg1: i32) -> (i32, i32, i32) {
    %c0_i32 = arith.constant 0 : i32
    %c0_i32_0 = arith.constant 0 : i32
    return %arg1, %arg0, %c0_i32 : i32, i32, i32
  }
}

</mosaic_0001>

<bundles_post_ra>
// kernel: tpu_custom_call.1
= control target key start
LH: loop header
LB: loop body
LE: loop exit
PB: predicated region body
PF: predicated region fallthrough
CT: control target
= control target key end

     0   :  { %s467_s12 = smov 0   ;;  %s469_s13 = smov 0   ;;  %s509_s0 = inlined_call_operand.vmem [shape: f32[16,32], index: 0, kind: input, shape index: {}]   ;;  %s510_s1 = inlined_call_operand.vmem [shape: f32[4,32,8], index: 1, kind: input, shape index: {}]   ;;  %s511_s2 = inlined_call_operand.vmem [shape: f32[4,1,8], index: 2, kind: input, shape index: {}]   ;;  %s512_s3 = inlined_call_operand.vmem [shape: f32[4,16,8], index: 3, kind: output, shape index: {}]  }
   0x1   :  { %s471_s14 = smov 0  }
   0x2 LB: > { %s22_s15 = sadd.s32 1, %s441_s13  ;;  %p383_p0 = scmp.ge.s32.totalorder %s445_s14, 1  ;;  %s445_s14 = sphi %s471_s14, %s13_s14   ;;  %s441_s13 = sphi %s469_s13, %s514_s13   ;;  %s437_s12 = sphi %s467_s12, %s513_s12  }
   0x3   : > { %p23_p1 = scmp.ge.s32.totalorder %s22_s15, 4  ;;  %p170_p2 = scmp.lt.s32.totalorder %s445_s14, 5 }
   0x5   : > { %s516_s15 = smov (%p23_p1, %s22_s15), 0  ;;  %p171_p3 = pnand %p383_p0, %p170_p2 }
   0x6   : > { %p212_p4 = scmp.lt.s32.totalorder (!%p171_p3), %s437_s12, 3 }
   0x7   : > { %174 = sbr.rel (%p171_p3) target bundleno = 153 (0x99), region = 32 }
   0xc   : > { %s518_s12 = smov (!%p212_p4, %s437_s12), 3  ;;  %v230_v4 = vld [vmem:[%s509_s0] sm:$0xff]  ;;  %vm240_vm0 = vcmask 261120   ;;  %v231_v5 = vld [vmem:[%s509_s0 + $0x8] sm:$0xff]  ;;  %vm270_vm1 = vcmask 64512  }
   0xd   : > { %s392_s16 = sshll.u32 %s518_s12, 5  ;;  %s219_s19 = scalar_lea.vmem %s511_s2, %s518_s12 }
   0xe   : > { %s216_s22 = scalar_lea.vmem %s510_s1, %s392_s16  ;;  %s393_s27 = sshll.u32 %s518_s12, 4  ;;  %v422_v6 = vld [vmem:[%s219_s19] ss:$0 sm:$0xff] }
   0xf   : > { %v235_v0 = vld [vmem:[%s216_s22 + $0x18] sm:$0xff]  ;;  %v234_v1 = vld [vmem:[%s216_s22 + $0x10] sm:$0xff]  ;;  %v233_v2 = vld [vmem:[%s216_s22 + $0x8] sm:$0xff]  ;;  %s228_s30 = scalar_lea.vmem %s512_s3, %s393_s27 }
  0x10   : > { %259 = vmatpush.msra.mxu0 %v235_v0  ;;  %394 = vmatpush.msra.mxu1 %v235_v0  ;;  %v232_v3 = vld [vmem:[%s216_s22] sm:$0xff] }
  0x12   : > { %260 = vmatpush.msra.mxu0 %v234_v1  ;;  %395 = vmatpush.msra.mxu1 %v234_v1 }
  0x14   : > { %261 = vmatpush.msra.mxu0 %v233_v2  ;;  %396 = vmatpush.msra.mxu1 %v233_v2 }
  0x16   : > { %262 = vmatpush.msra.mxu0 %v232_v3  ;;  %397 = vmatpush.msra.mxu1 %v232_v3 }
  0x17   : > { %388 = vmatmul.msk.f32.vlgmr.msra.gmra.mxu0 %vm240_vm0, %v230_v4  ;;  %389 = vmatmul.msk.f32.vlgmr.msra.gmra.mxu1 %vm240_vm0, %v231_v5 }
  0x94   : > { %v264_v7 = vpop.f32.mrf.mxu0  ;;  %v267_v8 = vpop.f32.mrf.mxu1 }
  0x95   : > { %v265_v9 = vadd.f32 %v422_v6, %v264_v7  ;;  %v268_v10 = vadd.f32 %v422_v6, %v267_v8 }
  0x97   : > { %271 = vst.msk [vmem:[%s228_s30] sm:$0xff] %vm270_vm1, %v265_v9 }
  0x98   : > { %272 = vst.msk [vmem:[%s228_s30 + $0x8] sm:$0xff] %vm270_vm1, %v268_v10 }
  0x99 PF: > { %s13_s14 = sadd.s32 1, %s445_s14   ;;  %s513_s12 = smov %s441_s13 }
  0x9a   : > { %p10_p5 = scmp.ge.s32.totalorder %s13_s14, 6   ;;  %s514_s13 = smov %s516_s15 }
  0x9c   :  { %12 = sbr.rel (!%p10_p5) target bundleno = 2 (0x2), region = 68 }

</bundles_post_ra>
